<compile_context>
chip_gen: v5e
topology: v5e:2x2
jax: 0.10.0
libtpu: 0.0.40
codegen_flags: <defaults>
</compile_context>

<pallas_src>
import functools

import jax
import jax.numpy as jnp
from jax import lax
from jax.experimental import pallas as pl
from jax.experimental.pallas import tpu as pltpu


def _round_up(x: int, m: int) -> int:
    return (x + m - 1) // m * m


def _cdiv(a: int, b: int) -> int:
    return -(-a // b)


def _choose_row_tile(n_rows: int, tm_max: int, step_overhead_rows: int = 256) -> int:
    """Row tile: multiple of 8, <= tm_max.  Prefers >=2 grid steps (v7x has two
    TensorCores), multiples of 128 (regular in-kernel sub-blocking) and balances
    per-grid-step pipeline overhead against row-padding waste."""
    n8 = _round_up(n_rows, 8)
    if n8 <= 256:
        return n8                                   # tiny problem: one step, no padding
    cands = list(range(128, tm_max + 1, 128))
    two_step = [t for t in cands if _cdiv(n8, t) >= 2]
    if two_step:                                    # let both v7x TensorCores get work
        cands = two_step

    def cost(t):
        steps = _cdiv(n8, t)
        # per-step pipeline overhead modeled as ~256 extra rows; tie-break on padding
        return (steps * (t + step_overhead_rows), steps * t - n8)

    return min(cands, key=cost)


def _choose_sub_tile(tm_eff: int) -> int:
    """Largest divisor of tm_eff that is a multiple of 8 and <= 128 (keeps the
    one-hot intermediates within the 64-entry vreg file)."""
    for s in range(128, 7, -8):
        if s <= tm_eff and tm_eff % s == 0:
            return s
    return tm_eff


def _input_embedding_kernel(x_ref, pos_ref, wT_ref, pe0_ref, pe1_ref, b_ref, o_ref,
                            *, sub: int):
    tm = x_ref.shape[0]
    p0 = pe0_ref.shape[0]
    p1 = pe1_ref.shape[0]

    wT = wT_ref[...]                                # (Din, Dout)  resident
    pe0 = pe0_ref[...]                              # (P0,  Dout)  resident
    pe1 = pe1_ref[...]                              # (P1,  Dout)  resident
    bias = b_ref[...]                               # (1,   Dout)  resident

    # Column-index rows built once per grid step (single-sublane lane iotas).
    col0 = lax.broadcasted_iota(jnp.int32, (1, p0), 1)
    col1 = lax.broadcasted_iota(jnp.int32, (1, p1), 1)

    def body(i, carry):
        r = pl.multiple_of(i * sub, sub)
        x = x_ref[pl.ds(r, sub), :]                 # (sub, Din) f32
        pos = pos_ref[pl.ds(r, sub), :]             # (sub, 2)   int32
        ids0 = pos[:, 0:1]
        ids1 = pos[:, 1:2]

        # Linear + bias (MXU dot + tiny broadcast add).
        y = jnp.dot(x, wT, preferred_element_type=jnp.float32) + bias

        # PE gathers as one-hot matmuls: ONE compare per table.
        oh0 = (col0 == ids0).astype(jnp.float32)    # (sub, P0)
        y = y + jnp.dot(oh0, pe0, preferred_element_type=jnp.float32)
        oh1 = (col1 == ids1).astype(jnp.float32)    # (sub, P1)
        y = y + jnp.dot(oh1, pe1, preferred_element_type=jnp.float32)

        o_ref[pl.ds(r, sub), :] = y.astype(o_ref.dtype)
        return carry

    lax.fori_loop(0, tm // sub, body, 0, unroll=True)


@functools.partial(jax.jit, static_argnames=("tm_max",))
def input_embedding(x, pos, w, b, pe0, pe1, *, tm_max: int = 1024):
    """x: [B, S, Din] f32, pos: [B, S, 2] int, w: [Dout, Din], b: [Dout],
    pe0: [P0, Dout], pe1: [P1, Dout]  ->  [B, S, Dout] f32."""
    B, S, Din = x.shape
    Dout = w.shape[0]
    P0, P1 = pe0.shape[0], pe1.shape[0]
    N = B * S

    tm_eff = _choose_row_tile(N, int(tm_max))
    sub = _choose_sub_tile(tm_eff)
    n_pad = _round_up(N, tm_eff)

    x2 = x.reshape(N, Din).astype(jnp.float32)
    pos2 = pos.reshape(N, 2).astype(jnp.int32)
    if n_pad != N:
        x2 = jnp.pad(x2, ((0, n_pad - N), (0, 0)))
        pos2 = jnp.pad(pos2, ((0, n_pad - N), (0, 0)))  # index 0 -> valid; rows sliced off

    wT = jnp.transpose(w).astype(jnp.float32)           # (Din, Dout)
    b2 = b.astype(jnp.float32).reshape(1, Dout)

    # Pad PE tables to a multiple of 8 rows (zero rows are never selected by valid indices).
    P0p, P1p = _round_up(P0, 8), _round_up(P1, 8)
    pe0f = jnp.zeros((P0p, Dout), jnp.float32).at[:P0].set(pe0.astype(jnp.float32))
    pe1f = jnp.zeros((P1p, Dout), jnp.float32).at[:P1].set(pe1.astype(jnp.float32))

    grid = (n_pad // tm_eff,)
    flops = 2 * n_pad * (Din + P0p + P1p) * Dout
    bytes_accessed = 4 * (n_pad * (Din + 2 + Dout)
                          + Din * Dout + (P0p + P1p + 1) * Dout)

    kernel = functools.partial(_input_embedding_kernel, sub=sub)
    out = pl.pallas_call(
        kernel,
        out_shape=jax.ShapeDtypeStruct((n_pad, Dout), x.dtype),
        grid_spec=pltpu.PrefetchScalarGridSpec(
            num_scalar_prefetch=0,
            grid=grid,
            in_specs=[
                pl.BlockSpec((tm_eff, Din), lambda i: (i, 0)),   # x rows   (pipelined)
                pl.BlockSpec((tm_eff, 2), lambda i: (i, 0)),     # pos rows (pipelined)
                pl.BlockSpec((Din, Dout), lambda i: (0, 0)),     # W^T      (resident)
                pl.BlockSpec((P0p, Dout), lambda i: (0, 0)),     # PE0      (resident)
                pl.BlockSpec((P1p, Dout), lambda i: (0, 0)),     # PE1      (resident)
                pl.BlockSpec((1, Dout), lambda i: (0, 0)),       # bias     (resident)
            ],
            out_specs=pl.BlockSpec((tm_eff, Dout), lambda i: (i, 0)),
        ),
        compiler_params=pltpu.CompilerParams(
            dimension_semantics=("parallel",)),
        cost_estimate=pl.CostEstimate(
            flops=flops, transcendentals=0, bytes_accessed=bytes_accessed),
    )(x2, pos2, wT, pe0f, pe1f, b2)

    return out[:N].reshape(B, S, Dout)


def _reference(x, pos, w, b, pe0, pe1):
    y = jnp.einsum("bsi,oi->bso", x, w) + b
    y = y + pe0[pos[..., 0]] + pe1[pos[..., 1]]
    return y


def _make_inputs(key, B, S, Din, Dout, max_positions):
    kx, kp0, kp1, kw, kb, ke0, ke1 = jax.random.split(key, 7)
    x = jax.random.normal(kx, (B, S, Din), dtype=jnp.float32)
    pos = jnp.stack(
        [
            jax.random.randint(kp0, (B, S), 0, max_positions[0]),
            jax.random.randint(kp1, (B, S), 0, max_positions[1]),
        ],
        axis=-1,
    ).astype(jnp.int32)
    w = jax.random.normal(kw, (Dout, Din), jnp.float32) * 0.1
    b = jax.random.normal(kb, (Dout,), jnp.float32) * 0.1
    pe0 = jax.random.normal(ke0, (max_positions[0], Dout), jnp.float32) * 0.1
    pe1 = jax.random.normal(ke1, (max_positions[1], Dout), jnp.float32) * 0.1
    return x, pos, w, b, pe0, pe1


if __name__ == "__main__":
    input_token_length = 16       # Din
    embedded_token_length = 32    # Dout
    max_positions = [48, 256]

    key = jax.random.PRNGKey(0)
    k1, k2, k3 = jax.random.split(key, 3)

    # Small module-consistent shapes (single-step grid, single sub-block).
    x, pos, w, b, pe0, pe1 = _make_inputs(
        k1, 2, 8, input_token_length, embedded_token_length, max_positions)
    out = jax.block_until_ready(input_embedding(x, pos, w, b, pe0, pe1))
    ref = _reference(x, pos, w, b, pe0, pe1)
    assert out.shape == (2, 8, embedded_token_length)
    assert jnp.allclose(out, ref, atol=1e-5, rtol=1e-5), "mismatch vs reference (small)"

    # Multi-step grid + row padding + 128-row inner sub-blocking (N=300).
    x, pos, w, b, pe0, pe1 = _make_inputs(
        k2, 3, 100, input_token_length, embedded_token_length, max_positions)
    out = jax.block_until_ready(input_embedding(x, pos, w, b, pe0, pe1))
    ref = _reference(x, pos, w, b, pe0, pe1)
    assert out.shape == (3, 100, embedded_token_length)
    assert jnp.allclose(out, ref, atol=1e-5, rtol=1e-5), "mismatch vs reference (tiled)"

    # Mid-size, padding-free case (N=2048 -> 2 x 1024-row tiles, 8 inner sub-blocks each).
    x, pos, w, b, pe0, pe1 = _make_inputs(
        k3, 4, 512, input_token_length, embedded_token_length, max_positions)
    out = jax.block_until_ready(input_embedding(x, pos, w, b, pe0, pe1))
    ref = _reference(x, pos, w, b, pe0, pe1)
    assert out.shape == (4, 512, embedded_token_length)
    assert jnp.allclose(out, ref, atol=1e-5, rtol=1e-5), "mismatch vs reference (mid)"

    print("KERNEL_OK")
</pallas_src>

<mosaic_0001>
module attributes {stable_mosaic.version = 11 : i64} {
  func.func @_input_embedding_kernel(%arg0: i32, %arg1: memref<16x16xf32, #tpu.memory_space<vmem>>, %arg2: memref<16x2xi32, #tpu.memory_space<vmem>>, %arg3: memref<16x32xf32, #tpu.memory_space<vmem>>, %arg4: memref<48x32xf32, #tpu.memory_space<vmem>>, %arg5: memref<256x32xf32, #tpu.memory_space<vmem>>, %arg6: memref<1x32xf32, #tpu.memory_space<vmem>>, %arg7: memref<16x32xf32, #tpu.memory_space<vmem>>) attributes {dimension_semantics = [#tpu.dimension_semantics<parallel>], iteration_bounds = array<i64: 1>, scalar_prefetch = 0 : i64, scratch_operands = 0 : i64, tpu.core_type = #tpu.core_type<tc>, window_params = [{transform_indices = @transform_0, window_bounds = array<i64: 16, 16>}, {transform_indices = @transform_1, window_bounds = array<i64: 16, 2>}, {pipeline_mode = #tpu.pipeline_mode<synchronous>, transform_indices = @transform_2, window_bounds = array<i64: 16, 32>}, {pipeline_mode = #tpu.pipeline_mode<synchronous>, transform_indices = @transform_3, window_bounds = array<i64: 48, 32>}, {pipeline_mode = #tpu.pipeline_mode<synchronous>, transform_indices = @transform_4, window_bounds = array<i64: 256, 32>}, {pipeline_mode = #tpu.pipeline_mode<synchronous>, transform_indices = @transform_5, window_bounds = array<i64: 1, 32>}, {transform_indices = @transform_6, window_bounds = array<i64: 16, 32>}]} {
    %c0 = arith.constant 0 : index
    %c0_0 = arith.constant 0 : index
    %0 = vector.load %arg3[%c0, %c0_0] : memref<16x32xf32, #tpu.memory_space<vmem>>, vector<16x32xf32>
    %c0_1 = arith.constant 0 : index
    %c0_2 = arith.constant 0 : index
    %1 = vector.load %arg4[%c0_1, %c0_2] : memref<48x32xf32, #tpu.memory_space<vmem>>, vector<48x32xf32>
    %c0_3 = arith.constant 0 : index
    %c0_4 = arith.constant 0 : index
    %2 = vector.load %arg5[%c0_3, %c0_4] : memref<256x32xf32, #tpu.memory_space<vmem>>, vector<256x32xf32>
    %c0_5 = arith.constant 0 : index
    %c0_6 = arith.constant 0 : index
    %3 = vector.load %arg6[%c0_5, %c0_6] : memref<1x32xf32, #tpu.memory_space<vmem>>, vector<1x32xf32>
    %4 = tpu.iota {dimensions = array<i32: 1>} : vector<1x48xi32>
    %5 = tpu.iota {dimensions = array<i32: 1>} : vector<1x256xi32>
    %c0_i32 = arith.constant 0 : i32
    %c16_i32 = arith.constant 16 : i32
    %6 = arith.muli %c0_i32, %c16_i32 : i32
    %7 = tpu.assume_multiple %6, 16 : i32
    %8 = arith.index_cast %7 : i32 to index
    %c0_7 = arith.constant 0 : index
    %9 = vector.load %arg1[%8, %c0_7] : memref<16x16xf32, #tpu.memory_space<vmem>>, vector<16x16xf32>
    %10 = arith.index_cast %7 : i32 to index
    %c0_8 = arith.constant 0 : index
    %11 = vector.load %arg2[%10, %c0_8] : memref<16x2xi32, #tpu.memory_space<vmem>>, vector<16x2xi32>
    %12 = vector.extract_strided_slice %11 {offsets = [0, 0], sizes = [16, 1], strides = [1, 1]} : vector<16x2xi32> to vector<16x1xi32>
    %13 = vector.extract_strided_slice %11 {offsets = [0, 1], sizes = [16, 1], strides = [1, 1]} : vector<16x2xi32> to vector<16x1xi32>
    %cst = arith.constant dense<0.000000e+00> : vector<16x32xf32>
    %14 = tpu.matmul %9, %0, %cst {dimension_numbers = #tpu.dot_dimension_numbers<[1], [0], [0], [1], [0, 0, 1, 1], [], []>} : vector<16x16xf32>, vector<16x32xf32>, vector<16x32xf32> -> vector<16x32xf32>
    %15 = vector.broadcast %3 : vector<1x32xf32> to vector<16x32xf32>
    %16 = arith.addf %14, %15 : vector<16x32xf32>
    %17 = vector.broadcast %4 : vector<1x48xi32> to vector<16x48xi32>
    %18 = vector.broadcast %12 : vector<16x1xi32> to vector<16x48xi32>
    %19 = arith.cmpi eq, %17, %18 : vector<16x48xi32>
    %20 = arith.extui %19 : vector<16x48xi1> to vector<16x48xi32>
    %21 = arith.sitofp %20 : vector<16x48xi32> to vector<16x48xf32>
    %cst_9 = arith.constant dense<0.000000e+00> : vector<16x32xf32>
    %22 = tpu.matmul %21, %1, %cst_9 {dimension_numbers = #tpu.dot_dimension_numbers<[1], [0], [0], [1], [0, 0, 1, 1], [], []>} : vector<16x48xf32>, vector<48x32xf32>, vector<16x32xf32> -> vector<16x32xf32>
    %23 = arith.addf %16, %22 : vector<16x32xf32>
    %24 = vector.broadcast %5 : vector<1x256xi32> to vector<16x256xi32>
    %25 = vector.broadcast %13 : vector<16x1xi32> to vector<16x256xi32>
    %26 = arith.cmpi eq, %24, %25 : vector<16x256xi32>
    %27 = arith.extui %26 : vector<16x256xi1> to vector<16x256xi32>
    %28 = arith.sitofp %27 : vector<16x256xi32> to vector<16x256xf32>
    %cst_10 = arith.constant dense<0.000000e+00> : vector<16x32xf32>
    %29 = tpu.matmul %28, %2, %cst_10 {dimension_numbers = #tpu.dot_dimension_numbers<[1], [0], [0], [1], [0, 0, 1, 1], [], []>} : vector<16x256xf32>, vector<256x32xf32>, vector<16x32xf32> -> vector<16x32xf32>
    %30 = arith.addf %23, %29 : vector<16x32xf32>
    %31 = arith.index_cast %7 : i32 to index
    %c0_11 = arith.constant 0 : index
    %32 = vector.load %arg7[%31, %c0_11] : memref<16x32xf32, #tpu.memory_space<vmem>>, vector<16x32xf32>
    tpu.vector_store %arg7[%31, %c0_11], %30 {strides = array<i32>} : memref<16x32xf32, #tpu.memory_space<vmem>>, vector<16x32xf32>,
    %c1_i32 = arith.constant 1 : i32
    return
  }
  func.func @transform_0(%arg0: i32) -> (i32, i32) {
    %c0_i32 = arith.constant 0 : i32
    %c0_i32_0 = arith.constant 0 : i32
    return %arg0, %c0_i32 : i32, i32
  }
  func.func @transform_1(%arg0: i32) -> (i32, i32) {
    %c0_i32 = arith.constant 0 : i32
    %c0_i32_0 = arith.constant 0 : i32
    return %arg0, %c0_i32 : i32, i32
  }
  func.func @transform_2(%arg0: i32) -> (i32, i32) {
    %c0_i32 = arith.constant 0 : i32
    %c0_i32_0 = arith.constant 0 : i32
    %c0_i32_1 = arith.constant 0 : i32
    return %c0_i32, %c0_i32_0 : i32, i32
  }
  func.func @transform_3(%arg0: i32) -> (i32, i32) {
    %c0_i32 = arith.constant 0 : i32
    %c0_i32_0 = arith.constant 0 : i32
    %c0_i32_1 = arith.constant 0 : i32
    return %c0_i32, %c0_i32_0 : i32, i32
  }
  func.func @transform_4(%arg0: i32) -> (i32, i32) {
    %c0_i32 = arith.constant 0 : i32
    %c0_i32_0 = arith.constant 0 : i32
    %c0_i32_1 = arith.constant 0 : i32
    return %c0_i32, %c0_i32_0 : i32, i32
  }
  func.func @transform_5(%arg0: i32) -> (i32, i32) {
    %c0_i32 = arith.constant 0 : i32
    %c0_i32_0 = arith.constant 0 : i32
    %c0_i32_1 = arith.constant 0 : i32
    return %c0_i32, %c0_i32_0 : i32, i32
  }
  func.func @transform_6(%arg0: i32) -> (i32, i32) {
    %c0_i32 = arith.constant 0 : i32
    %c0_i32_0 = arith.constant 0 : i32
    return %arg0, %c0_i32 : i32, i32
  }
}

</mosaic_0001>

<bundles_post_ra>
// kernel: input_embedding.1
= control target key start
LH: loop header
LB: loop body
LE: loop exit
PB: predicated region body
PF: predicated region fallthrough
CT: control target
= control target key end

     0   :  { %v305_v3 = vmov 1   ;;  %vm75_vm0 = vcmask 130048   ;;  %v306_v14 = vmov 0   ;;  %s487_s0 = inlined_call_operand.vmem [shape: f32[16,16], index: 0, kind: input, shape index: {}]   ;;  %s488_s1 = inlined_call_operand.vmem [shape: s32[16,2], index: 1, kind: input, shape index: {}]   ;;  %s489_s2 = inlined_call_operand.vmem [shape: f32[16,32], index: 2, kind: input, shape index: {}]   ;;  %s490_s3 = inlined_call_operand.vmem [shape: f32[48,32], index: 3, kind: input, shape index: {}]   ;;  %s491_s4 = inlined_call_operand.vmem [shape: f32[256,32], index: 4, kind: input, shape index: {}]   ;;  %s492_s5 = inlined_call_operand.vmem [shape: f32[1,32], index: 5, kind: input, shape index: {}]   ;;  %s493_s6 = inlined_call_operand.hbm [shape: f32[16,32], index: 6, kind: output, shape index: {}]  }
   0x1   :  { %v70_v0 = vld [vmem:[%s488_s1] sm:$0xff]  ;;  %v71_v1 = vld [vmem:[%s488_s1 + $0x8] sm:$0xff]  ;;  %273 = vset.pattern.permute.xlu0 %v305_v3  ;;  %275 = vset.pattern.permute.xlu1 %v305_v3  ;;  %v63_v4 = vld [vmem:[%s491_s4 + $0xf8] sm:$0xff] }
   0x2   :  { %v25_v2 = vld [vmem:[%s489_s2 + $0x8] sm:$0xff]  ;;  %150 = vperm.xlu0 %273, %v70_v0   ;;  %153 = vperm.xlu1 %275, %v71_v1   ;;  %v24_v5 = vld [vmem:[%s489_s2] sm:$0xff]  ;;  %v62_v6 = vld [vmem:[%s491_s4 + $0xf0] sm:$0xff] }
   0x3   :  { %96 = vmatpush.msra.mxu0 %v25_v2  ;;  %v47_v7 = vld [vmem:[%s491_s4 + $0x78] sm:$0xff]  ;;  %190 = vmatpush.msra.mxu3 %v63_v4  ;;  %v61_v8 = vld [vmem:[%s491_s4 + $0xe8] sm:$0xff]  ;;  %v46_v9 = vld [vmem:[%s491_s4 + $0x70] sm:$0xff] }
   0x4   :  { %250 = vmatpush.msra.mxu2 %v47_v7  ;;  %v60_v10 = vld [vmem:[%s491_s4 + $0xe0] sm:$0xff]  ;;  %v45_v12 = vld [vmem:[%s491_s4 + $0x68] sm:$0xff]  ;;  %v59_v13 = vld [vmem:[%s491_s4 + $0xd8] sm:$0xff] }
   0x5   :  { %97 = vmatpush.msra.mxu0 %v24_v5  ;;  %191 = vmatpush.msra.mxu3 %v62_v6  ;;  %v68_v11 = vld [vmem:[%s487_s0] sm:$0xff]  ;;  %v58_v16 = vld [vmem:[%s491_s4 + $0xd0] sm:$0xff]  ;;  %v69_v17 = vld [vmem:[%s487_s0 + $0x8] sm:$0xff] }
   0x6   :  { %251 = vmatpush.msra.mxu2 %v46_v9  ;;  %236 = vmatmul.msk.f32.vlgmr.msra.gmra.mxu0 %vm75_vm0, %v68_v11  ;;  %v44_v15 = vld [vmem:[%s491_s4 + $0x60] sm:$0xff] }
   0x7   :  { %167 = vmatpush.msrb.mxu0 %v47_v7  ;;  %192 = vmatpush.msra.mxu3 %v61_v8 }
   0x8   :  { %252 = vmatpush.msra.mxu2 %v45_v12 }
   0x9   :  { %168 = vmatpush.msrb.mxu0 %v46_v9  ;;  %193 = vmatpush.msra.mxu3 %v60_v10 }
   0xa   :  { %274 = vset.pattern.permute.xlu0 %v306_v14  ;;  %276 = vset.pattern.permute.xlu1 %v306_v14 }
   0xb   :  { %106 = vperm.xlu0 %274, %v70_v0   ;;  %109 = vperm.xlu1 %276, %v71_v1  }
   0xc   :  { %169 = vmatpush.msrb.mxu0 %v45_v12  ;;  %194 = vmatpush.msra.mxu3 %v59_v13 }
   0xd   :  { %11 = vsyncpa [#allocation3], 0  ;;  %v43_v18 = vld [vmem:[%s491_s4 + $0x58] sm:$0xff]  ;;  %v57_v19 = vld [vmem:[%s491_s4 + $0xc8] sm:$0xff]  ;;  %253 = vmatpush.msra.mxu2 %v44_v15  ;;  %v65_v46 = vlaneseq  ;;  %v307_v51 = vmov 1.0   ;;  %vm117_vm5 = vcmask 392192  }
   0xe   :  { %170 = vmatpush.msrb.mxu0 %v44_v15  ;;  %195 = vmatpush.msra.mxu3 %v58_v16  ;;  %v42_v20 = vld [vmem:[%s491_s4 + $0x50] sm:$0xff]  ;;  %v56_v21 = vld [vmem:[%s491_s4 + $0xc0] sm:$0xff]  ;;  %v41_v22 = vld [vmem:[%s491_s4 + $0x48] sm:$0xff]  ;;  %v308_v53 = vmov 0.0   ;;  %vm215_vm8 = vcmask 261120   ;;  %s309_s29 = smov [#allocation2]  }
   0xf   :  { %254 = vmatpush.msra.mxu2 %v43_v18  ;;  %237 = vmatmul.msk.f32.gmra.mxu0 %vm75_vm0, %v69_v17  ;;  %v55_v23 = vld [vmem:[%s491_s4 + $0xb8] sm:$0xff]  ;;  %v40_v24 = vld [vmem:[%s491_s4 + $0x40] sm:$0xff]  ;;  %v54_v25 = vld [vmem:[%s491_s4 + $0xb0] sm:$0xff]  ;;  %v66_v47 = vand.u32 127, %v65_v46  ;;  %s222_s30 = sshll.u32 %s309_s29, 4  ;;  %s224_s1 = sshll.u32 %s493_s6, 4  ;;  %s223_s30 = int_to_ptr.vmem [resolvable:$true] %s222_s30  ;;  %s225_s1 = int_to_ptr.hbm [resolvable:$true] %s224_s1 }
  0x10   :  { %171 = vmatpush.msrb.mxu0 %v43_v18  ;;  %196 = vmatpush.msra.mxu3 %v57_v19  ;;  %v39_v26 = vld [vmem:[%s491_s4 + $0x38] sm:$0xff]  ;;  %v53_v27 = vld [vmem:[%s491_s4 + $0xa8] sm:$0xff]  ;;  %v38_v28 = vld [vmem:[%s491_s4 + $0x30] sm:$0xff]  ;;  %s311_s9 = smov 8  }
  0x11   :  { %255 = vmatpush.msra.mxu2 %v42_v20  ;;  %v52_v29 = vld [vmem:[%s491_s4 + $0xa0] sm:$0xff]  ;;  %v37_v30 = vld [vmem:[%s491_s4 + $0x28] sm:$0xff]  ;;  %v51_v31 = vld [vmem:[%s491_s4 + $0x98] sm:$0xff]  ;;  %v67_v48 = vadd.s32 128, %v66_v47 }
  0x12   :  { %172 = vmatpush.msrb.mxu0 %v42_v20  ;;  %197 = vmatpush.msra.mxu3 %v56_v21  ;;  %v36_v32 = vld [vmem:[%s491_s4 + $0x20] sm:$0xff]  ;;  %v50_v33 = vld [vmem:[%s491_s4 + $0x90] sm:$0xff]  ;;  %v35_v34 = vld [vmem:[%s491_s4 + $0x18] sm:$0xff] }
  0x13   :  { %256 = vmatpush.msra.mxu2 %v41_v22  ;;  %277 = vset.pattern.permute.xlu0 %v305_v3  ;;  %v49_v35 = vld [vmem:[%s491_s4 + $0x88] sm:$0xff]  ;;  %v34_v36 = vld [vmem:[%s491_s4 + $0x10] sm:$0xff]  ;;  %v32_v39 = vld [vmem:[%s491_s4] sm:$0xff] }
  0x14   :  { %173 = vmatpush.msrb.mxu0 %v41_v22  ;;  %198 = vmatpush.msra.mxu3 %v55_v23  ;;  %v33_v37 = vld [vmem:[%s491_s4 + $0x8] sm:$0xff]  ;;  %v48_v40 = vld [vmem:[%s491_s4 + $0x80] sm:$0xff]  ;;  %v29_v42 = vld [vmem:[%s490_s3 + $0x18] sm:$0xff] }
  0x15   :  { %257 = vmatpush.msra.mxu2 %v40_v24  ;;  %v31_v38 = vld [vmem:[%s490_s3 + $0x28] sm:$0xff]  ;;  %v30_v41 = vld [vmem:[%s490_s3 + $0x20] sm:$0xff]  ;;  %v28_v43 = vld [vmem:[%s490_s3 + $0x10] sm:$0xff] }
  0x16   :  { %174 = vmatpush.msrb.mxu0 %v40_v24  ;;  %199 = vmatpush.msra.mxu3 %v54_v25  ;;  %v27_v44 = vld [vmem:[%s490_s3 + $0x8] sm:$0xff]  ;;  %v26_v45 = vld [vmem:[%s490_s3] sm:$0xff] }
  0x17   :  { %258 = vmatpush.msra.mxu2 %v39_v26  ;;  %134 = vmatpush.msra.mxu1 %v31_v38  ;;  %v278_v59 = vld [vmem:[%s492_s5] ss:$0 sm:$0xff]  ;;  %s310_s5 = smov 128  }
  0x18   :  { %175 = vmatpush.msrb.mxu0 %v39_v26  ;;  %200 = vmatpush.msra.mxu3 %v53_v27 }
  0x19   :  { %259 = vmatpush.msra.mxu2 %v38_v28  ;;  %135 = vmatpush.msra.mxu1 %v30_v41 }
  0x1a   :  { %176 = vmatpush.msrb.mxu0 %v38_v28  ;;  %201 = vmatpush.msra.mxu3 %v52_v29 }
  0x1b   :  { %260 = vmatpush.msra.mxu2 %v37_v30  ;;  %136 = vmatpush.msra.mxu1 %v29_v42 }
  0x1c   :  { %177 = vmatpush.msrb.mxu0 %v37_v30  ;;  %202 = vmatpush.msra.mxu3 %v51_v31 }
  0x1d   :  { %261 = vmatpush.msra.mxu2 %v36_v32  ;;  %137 = vmatpush.msra.mxu1 %v28_v43 }
  0x1e   :  { %178 = vmatpush.msrb.mxu0 %v36_v32  ;;  %203 = vmatpush.msra.mxu3 %v50_v33 }
  0x1f   :  { %262 = vmatpush.msra.mxu2 %v35_v34  ;;  %138 = vmatpush.msra.mxu1 %v27_v44 }
  0x20   :  { %179 = vmatpush.msrb.mxu0 %v35_v34  ;;  %204 = vmatpush.msra.mxu3 %v49_v35 }
  0x21   :  { %263 = vmatpush.msra.mxu2 %v34_v36  ;;  %139 = vmatpush.msra.mxu1 %v26_v45 }
  0x22   :  { %180 = vmatpush.msrb.mxu0 %v34_v36  ;;  %205 = vmatpush.msra.mxu3 %v48_v40 }
  0x23   :  { %264 = vmatpush.msra.mxu2 %v33_v37 }
  0x24   :  { %181 = vmatpush.msrb.mxu0 %v33_v37 }
  0x25   :  { %265 = vmatpush.msra.mxu2 %v32_v39 }
  0x26   :  { %182 = vmatpush.msrb.mxu0 %v32_v39 }
  0x74   :  { %v151_v49 = vpop.permute.xlu0 %150  ;;  %v154_v50 = vpop.permute.xlu1 %153 }
  0x75   :  { %vm155_vm1 = vcmp.eq.s32.totalorder %v66_v47, %v151_v49  ;;  %vm156_vm2 = vcmp.eq.s32.totalorder %v67_v48, %v151_v49  ;;  %vm157_vm3 = vcmp.eq.s32.totalorder %v66_v47, %v154_v50  ;;  %vm158_vm4 = vcmp.eq.s32.totalorder %v67_v48, %v154_v50 }
  0x76   :  { %246 = vmatmul.msk.f32.vlgmr.msrb.gmra.mxu0 %vm155_vm1, %v307_v51  ;;  %248 = vmatmul.msk.f32.vlgmr.msra.gmra.mxu3 %vm156_vm2, %v307_v51 }
  0x77   :  { %247 = vmatmul.msk.f32.vlgmr.msra.gmra.mxu2 %vm157_vm3, %v307_v51 }
  0x7d   :  { %v107_v52 = vpop.permute.xlu0 %106  ;;  %v110_v55 = vpop.permute.xlu1 %109 }
  0x7e   :  { %vm111_vm6 = vcmp.eq.s32.totalorder %v66_v47, %v107_v52  ;;  %249 = vmatmul.msk.f32.gmra.mxu3 %vm158_vm4, %v307_v51  ;;  %vm112_vm7 = vcmp.eq.s32.totalorder %v66_v47, %v110_v55 }
  0x7f   :  { %v238_v54 = vsel %vm111_vm6, 1.0, %v308_v53  ;;  %v239_v56 = vsel %vm112_vm7, 1.0, %v308_v53 }
  0x80   :  { %240 = vmatmul.msk.f32.vlgmr.msra.gmra.mxu1 %vm117_vm5, %v238_v54 }
  0x83   :  { %v99_v57 = vpop.f32.mrf.mxu0 }
  0x84   :  { %v100_v61 = vadd.f32 %v278_v59, %v99_v57 }
  0x88   :  { %241 = vmatmul.msk.f32.gmra.mxu1 %vm117_vm5, %v239_v56 }
  0x8c   :  { %v102_v58 = vpop.f32.mrf.mxu0 }
  0x8d   :  { %v103_v5 = vadd.f32 %v278_v59, %v102_v58 }
  0xf3   :  { %v184_v62 = vpop.f32.mrf.mxu0 }
  0xf9   :  { %v207_v60 = vpop.f32.mrf.mxu3 }
  0xfa   :  { %v208_v0 = vadd.f32 %v207_v60, %v184_v62  ;;  %v187_v3 = vpop.f32.mrf.mxu2 }
  0xfd   :  { %v141_v63 = vpop.f32.mrf.mxu1 }
  0xfe   :  { %v147_v1 = vadd.f32 %v141_v63, %v100_v61 }
 0x100   :  { %v213_v2 = vadd.f32 %v208_v0, %v147_v1 }
 0x101   :  { %v210_v4 = vpop.f32.mrf.mxu3 }
 0x102   :  { %216 = vst.msk [vmem:[#allocation2] sm:$0xff] %vm215_vm8, %v213_v2  ;;  %v211_v7 = vadd.f32 %v210_v4, %v187_v3 }
 0x105   :  { %v144_v6 = vpop.f32.mrf.mxu1 }
 0x106   :  { %v148_v8 = vadd.f32 %v144_v6, %v103_v5 }
 0x108   :  { %v214_v9 = vadd.f32 %v211_v7, %v148_v8 }
 0x10a   :  { %217 = vst.msk [vmem:[#allocation2 + $0x8] sm:$0xff] %vm215_vm8, %v214_v9 }
 0x10b   :  { %230 = dma.vmem_to_hbm [thread:$0]  %s223_s30, 256, %s225_s1, [#allocation3], %s310_s5, %s310_s5, %s311_s9  }
 0x10c   :  { %303 = dma.done.wait [#allocation3], 256  }
 0x10d   :  { %304 = vsyncadd [#allocation3], 4294967040 }
 0x10e   :  { %235 = vsyncpa [#allocation3], 1 }

</bundles_post_ra>
